<compile_context>
chip_gen: v7x
topology: tpu7x:2x2x1
jax: 0.10.0
libtpu: 0.0.40
codegen_flags: <defaults>
</compile_context>

<pallas_src>
import functools

import jax
import jax.numpy as jnp
from jax import lax
from jax.experimental import pallas as pl
from jax.experimental.pallas import tpu as pltpu

INF = 1000000000.0  # matches the PyTorch module's masked_fill constant


def _sdp_kernel(*refs, inv_scale, has_mask):
    if has_mask:
        q_ref, k_ref, v_ref, m_ref, out_ref, attn_ref = refs
    else:
        q_ref, k_ref, v_ref, out_ref, attn_ref = refs
        m_ref = None

    q = q_ref[0] * inv_scale          # (TQ, D), native dtype, scalar literal mul
    k = k_ref[0]                      # (S, D)
    v = v_ref[0]                      # (S, D)

    # attn logits: (TQ, S) -- contract on D directly, no K transpose relayout.
    s = lax.dot_general(
        q, k,
        dimension_numbers=(((1,), (1,)), ((), ())),
        preferred_element_type=jnp.float32,
    )

    if has_mask:
        s = jnp.where(m_ref[0] == 0, -INF, s)

    # numerically-stable softmax over the key axis, deferred normalization.
    m = jnp.max(s, axis=-1, keepdims=True)
    e = jnp.exp(s - m)
    denom = jnp.sum(e, axis=-1, keepdims=True)
    # approx=False keeps attn bit-accurate vs the reference; approx=True would
    # move this to the EUP slot at ~1e-4 relative error.
    recip = pl.reciprocal(denom, approx=False)

    # out = (e @ V) * recip : the matmul does not wait for the reduction chain,
    # and the per-element normalize before the MXU is replaced by a (TQ, D) mul.
    # TODO(synk): for f32 inputs, optionally cast e/q/k to bf16 before the MXU
    # calls (keeping f32 accumulation) once the attn-writeback stream stops
    # being the bottleneck and the accuracy budget allows it.
    out = lax.dot_general(
        e.astype(v.dtype), v,
        dimension_numbers=(((1,), (0,)), ((), ())),
        preferred_element_type=jnp.float32,
    ) * recip

    attn_ref[0] = (e * recip).astype(attn_ref.dtype)
    out_ref[0] = out.astype(out_ref.dtype)


def _vmem_capacity_bytes():
    """Physical VMEM capacity; conservative (v7x = 64 MiB) if unknown."""
    try:
        info = pltpu.get_tpu_info()
        for name in ("vmem_capacity_bytes", "vmem_size_bytes", "vmem_bytes"):
            cap = getattr(info, name, None)
            if cap:
                return int(cap)
    except Exception:
        pass
    return 64 * 1024 * 1024


def _choose_tq(S, D, in_itemsize, attn_itemsize, budget, kv_bufs, cap_bytes):
    """Largest lane/sublane-friendly query tile whose working set fits VMEM."""
    candidates = [t for t in (512, 256, 128) if S % t == 0]
    if not candidates:
        return S  # small sequences: one tile == the full (valid) array extent
    # v7x (64 MiB VMEM): keep the attn block modest for long sequences.
    if cap_bytes <= 64 * 1024 * 1024 and S >= 2048:
        candidates = [t for t in candidates if t <= 256] or [min(candidates)]

    kv_bytes = 2 * kv_bufs * S * D * in_itemsize            # resident K + V
    for tq in candidates:
        need = (kv_bytes
                + 2 * tq * D * in_itemsize                   # Q tile (double-buffered)
                + 2 * tq * D * in_itemsize                   # out tile (double-buffered)
                + 2 * tq * S * attn_itemsize                 # attn tile (double-buffered)
                + 3 * tq * S * 4)                            # f32 softmax temps (s, e, attn)
        if need <= budget:
            return tq
    # TODO(synk): for very large S where even TQ=128 + resident K/V overflows
    # VMEM (e.g. S >= 8K, D = 128 on v7x), add a K-tiled inner grid axis with a
    # running max/denominator instead of shrinking TQ below 128.
    return candidates[-1]


def scale_dot_product(Q, K, V, mask=None, scale=1.0):
    """Pallas equivalent of ScaleDotProduct.forward(Q, K, V, mask)."""
    B, H, S, D = Q.shape
    BH = B * H
    q = Q.reshape(BH, S, D)
    k = K.reshape(BH, S, D)
    v = V.reshape(BH, S, D)

    has_mask = mask is not None
    if has_mask:
        mask_i = (jnp.broadcast_to(mask, (B, H, S, S)) != 0).astype(jnp.int32)
        mask_i = mask_i.reshape(BH, S, S)

    in_dtype = Q.dtype
    # attn kept in the input dtype to match torch semantics.
    # TODO(synk): offer bf16 attn (or skip attn entirely) when the caller
    # allows it -- the BH*S*S attn writeback dominates HBM traffic.
    attn_dtype = Q.dtype
    in_itemsize = jnp.dtype(in_dtype).itemsize
    attn_itemsize = jnp.dtype(attn_dtype).itemsize

    cap = _vmem_capacity_bytes()
    budget = min(int(cap * 0.65), 96 * 1024 * 1024)

    # Python float -> jaxpr literal, no captured const.
    # TODO(synk): if scale varies at runtime, feed 1/scale via an SMEM scalar
    # (scalar prefetch) instead to avoid a recompile per distinct value.
    inv_scale = 1.0 / float(scale)
    kernel = functools.partial(_sdp_kernel, inv_scale=inv_scale, has_mask=has_mask)

    def _run(single_buffer_kv):
        kv_bufs = 1 if single_buffer_kv else 2
        TQ = _choose_tq(S, D, in_itemsize, attn_itemsize, budget, kv_bufs, cap)
        num_q_tiles = S // TQ

        kv_kwargs = {"pipeline_mode": pl.Buffered(1)} if single_buffer_kv else {}
        in_specs = [
            pl.BlockSpec((1, TQ, D), lambda b, t: (b, t, 0)),              # Q tile
            pl.BlockSpec((1, S, D), lambda b, t: (b, 0, 0), **kv_kwargs),  # K resident per head
            pl.BlockSpec((1, S, D), lambda b, t: (b, 0, 0), **kv_kwargs),  # V resident per head
        ]
        args = [q, k, v]
        if has_mask:
            in_specs.append(pl.BlockSpec((1, TQ, S), lambda b, t: (b, t, 0)))
            args.append(mask_i)

        cost = pl.CostEstimate(
            flops=4 * BH * S * S * D,                      # QK^T + PV
            transcendentals=BH * S * S,                    # exp
            bytes_accessed=(4 * BH * S * D * in_itemsize   # q, k, v reads + out write
                            + BH * S * S * attn_itemsize   # attn write (dominant)
                            + (BH * S * S * 4 if has_mask else 0)),
        )

        return pl.pallas_call(
            kernel,
            out_shape=(
                jax.ShapeDtypeStruct((BH, S, D), Q.dtype),
                jax.ShapeDtypeStruct((BH, S, S), attn_dtype),
            ),
            grid_spec=pltpu.PrefetchScalarGridSpec(
                num_scalar_prefetch=0,
                grid=(BH, num_q_tiles),
                in_specs=in_specs,
                out_specs=[
                    pl.BlockSpec((1, TQ, D), lambda b, t: (b, t, 0)),  # out tile
                    pl.BlockSpec((1, TQ, S), lambda b, t: (b, t, 0)),  # attn tile
                ],
            ),
            compiler_params=pltpu.CompilerParams(
                # Split only the BH axis across TensorCores so a head's K/V is
                # fetched once per core (matters on v7x's 2 TCs).
                dimension_semantics=("parallel", "arbitrary"),
                vmem_limit_bytes=budget,
            ),
            cost_estimate=cost,
        )(*args)

    try:
        out, attn = _run(single_buffer_kv=True)
    except Exception:
        # pl.Buffered(1) not supported on this jax version -> fall back to the
        # default double-buffered K/V specs (identical semantics).
        out, attn = _run(single_buffer_kv=False)

    return out.reshape(B, H, S, D), attn.reshape(B, H, S, S)


def _reference(Q, K, V, mask=None, scale=1.0):
    attn = jnp.matmul(Q / scale, jnp.swapaxes(K, 2, 3))
    if mask is not None:
        attn = jnp.where(mask == 0, -INF, attn)
    attn = jax.nn.softmax(attn, axis=-1)
    out = jnp.matmul(attn, V)
    return out, attn


if __name__ == "__main__":
    key = jax.random.PRNGKey(0)
    kq, kk, kv_, km = jax.random.split(key, 4)

    B, H, S, D = 2, 4, 8, 32
    scale = 2.0  # module default is 1; use a non-trivial scale to exercise the divide

    Q = jax.random.normal(kq, (B, H, S, D), dtype=jnp.float32)
    K = jax.random.normal(kk, (B, H, S, D), dtype=jnp.float32)
    V = jax.random.normal(kv_, (B, H, S, D), dtype=jnp.float32)

    # --- unmasked path (mask=None, the module default) ---
    out, attn = scale_dot_product(Q, K, V, scale=scale)
    jax.block_until_ready((out, attn))
    out_ref, attn_ref = _reference(Q, K, V, scale=scale)
    assert out.shape == (B, H, S, D) and attn.shape == (B, H, S, S)
    assert jnp.allclose(out, out_ref, atol=1e-5, rtol=1e-5)
    assert jnp.allclose(attn, attn_ref, atol=1e-5, rtol=1e-5)

    # --- masked path (torch: attn.masked_fill(mask == 0, -1e9)) ---
    mask = (jax.random.uniform(km, (B, 1, S, S)) > 0.3).astype(jnp.int32)
    out_m, attn_m = scale_dot_product(Q, K, V, mask=mask, scale=scale)
    jax.block_until_ready((out_m, attn_m))
    out_mr, attn_mr = _reference(Q, K, V, mask=mask, scale=scale)
    assert jnp.allclose(out_m, out_mr, atol=1e-5, rtol=1e-5)
    assert jnp.allclose(attn_m, attn_mr, atol=1e-5, rtol=1e-5)

    print("KERNEL_OK")
</pallas_src>

<mosaic_0001>
module attributes {stable_mosaic.version = 11 : i64} {
  func.func @_sdp_kernel(%arg0: i32, %arg1: i32, %arg2: memref<1x8x32xf32, #tpu.memory_space<vmem>>, %arg3: memref<1x8x32xf32, #tpu.memory_space<vmem>>, %arg4: memref<1x8x32xf32, #tpu.memory_space<vmem>>, %arg5: memref<1x8x32xf32, #tpu.memory_space<vmem>>, %arg6: memref<1x8x8xf32, #tpu.memory_space<vmem>>) attributes {dimension_semantics = [#tpu.dimension_semantics<parallel>, #tpu.dimension_semantics<arbitrary>], iteration_bounds = array<i64: 8, 1>, scalar_prefetch = 0 : i64, scratch_operands = 0 : i64, tpu.core_type = #tpu.core_type<tc>, window_params = [{transform_indices = @transform_0, window_bounds = array<i64: 1, 8, 32>}, {pipeline_mode = #tpu.pipeline_mode<synchronous>, transform_indices = @transform_1, window_bounds = array<i64: 1, 8, 32>}, {pipeline_mode = #tpu.pipeline_mode<synchronous>, transform_indices = @transform_2, window_bounds = array<i64: 1, 8, 32>}, {transform_indices = @transform_3, window_bounds = array<i64: 1, 8, 32>}, {transform_indices = @transform_4, window_bounds = array<i64: 1, 8, 8>}]} {
    %c0 = arith.constant 0 : index
    %c0_0 = arith.constant 0 : index
    %c0_1 = arith.constant 0 : index
    %0 = vector.load %arg2[%c0, %c0_0, %c0_1] : memref<1x8x32xf32, #tpu.memory_space<vmem>>, vector<1x8x32xf32>
    %1 = vector.shape_cast %0 : vector<1x8x32xf32> to vector<8x32xf32>
    %cst = arith.constant 5.000000e-01 : f32
    %2 = vector.broadcast %cst : f32 to vector<8x32xf32>
    %3 = arith.mulf %1, %2 : vector<8x32xf32>
    %c0_2 = arith.constant 0 : index
    %c0_3 = arith.constant 0 : index
    %c0_4 = arith.constant 0 : index
    %4 = vector.load %arg3[%c0_2, %c0_3, %c0_4] : memref<1x8x32xf32, #tpu.memory_space<vmem>>, vector<1x8x32xf32>
    %5 = vector.shape_cast %4 : vector<1x8x32xf32> to vector<8x32xf32>
    %c0_5 = arith.constant 0 : index
    %c0_6 = arith.constant 0 : index
    %c0_7 = arith.constant 0 : index
    %6 = vector.load %arg4[%c0_5, %c0_6, %c0_7] : memref<1x8x32xf32, #tpu.memory_space<vmem>>, vector<1x8x32xf32>
    %7 = vector.shape_cast %6 : vector<1x8x32xf32> to vector<8x32xf32>
    %cst_8 = arith.constant dense<0.000000e+00> : vector<8x8xf32>
    %8 = tpu.matmul %3, %5, %cst_8 {dimension_numbers = #tpu.dot_dimension_numbers<[1], [1], [0], [0], [0, 0, 1, 0], [], []>} : vector<8x32xf32>, vector<8x32xf32>, vector<8x8xf32> -> vector<8x8xf32>
    %cst_9 = arith.constant dense<0xFF800000> : vector<8xf32>
    %9 = vector.multi_reduction <maximumf>, %8, %cst_9 [1] : vector<8x8xf32> to vector<8xf32>
    %10 = vector.shape_cast %9 : vector<8xf32> to vector<8x1xf32>
    %11 = vector.broadcast %10 : vector<8x1xf32> to vector<8x8xf32>
    %12 = arith.subf %8, %11 : vector<8x8xf32>
    %13 = math.exp %12 : vector<8x8xf32>
    %cst_10 = arith.constant dense<0.000000e+00> : vector<8xf32>
    %14 = vector.multi_reduction <add>, %13, %cst_10 [1] : vector<8x8xf32> to vector<8xf32>
    %15 = vector.shape_cast %14 : vector<8xf32> to vector<8x1xf32>
    %16 = tpu.reciprocal %15 : vector<8x1xf32> -> vector<8x1xf32>
    %cst_11 = arith.constant dense<0.000000e+00> : vector<8x32xf32>
    %17 = tpu.matmul %13, %7, %cst_11 {dimension_numbers = #tpu.dot_dimension_numbers<[1], [0], [0], [1], [0, 0, 1, 1], [], []>} : vector<8x8xf32>, vector<8x32xf32>, vector<8x32xf32> -> vector<8x32xf32>
    %18 = vector.broadcast %16 : vector<8x1xf32> to vector<8x32xf32>
    %19 = arith.mulf %17, %18 : vector<8x32xf32>
    %20 = vector.broadcast %16 : vector<8x1xf32> to vector<8x8xf32>
    %21 = arith.mulf %13, %20 : vector<8x8xf32>
    %c0_12 = arith.constant 0 : index
    %c0_13 = arith.constant 0 : index
    %c0_14 = arith.constant 0 : index
    %22 = vector.load %arg6[%c0_12, %c0_13, %c0_14] : memref<1x8x8xf32, #tpu.memory_space<vmem>>, vector<1x8x8xf32>
    %23 = vector.shape_cast %22 : vector<1x8x8xf32> to vector<8x8xf32>
    %24 = vector.shape_cast %21 : vector<8x8xf32> to vector<1x8x8xf32>
    tpu.vector_store %arg6[%c0_12, %c0_13, %c0_14], %24 {strides = array<i32>} : memref<1x8x8xf32, #tpu.memory_space<vmem>>, vector<1x8x8xf32>,
    %c0_15 = arith.constant 0 : index
    %c0_16 = arith.constant 0 : index
    %c0_17 = arith.constant 0 : index
    %25 = vector.load %arg5[%c0_15, %c0_16, %c0_17] : memref<1x8x32xf32, #tpu.memory_space<vmem>>, vector<1x8x32xf32>
    %26 = vector.shape_cast %25 : vector<1x8x32xf32> to vector<8x32xf32>
    %27 = vector.shape_cast %19 : vector<8x32xf32> to vector<1x8x32xf32>
    tpu.vector_store %arg5[%c0_15, %c0_16, %c0_17], %27 {strides = array<i32>} : memref<1x8x32xf32, #tpu.memory_space<vmem>>, vector<1x8x32xf32>,
    return
  }
  func.func @transform_0(%arg0: i32, %arg1: i32) -> (i32, i32, i32) {
    %c0_i32 = arith.constant 0 : i32
    %c0_i32_0 = arith.constant 0 : i32
    return %arg0, %arg1, %c0_i32 : i32, i32, i32
  }
  func.func @transform_1(%arg0: i32, %arg1: i32) -> (i32, i32, i32) {
    %c0_i32 = arith.constant 0 : i32
    %c0_i32_0 = arith.constant 0 : i32
    %c0_i32_1 = arith.constant 0 : i32
    return %arg0, %c0_i32, %c0_i32_0 : i32, i32, i32
  }
  func.func @transform_2(%arg0: i32, %arg1: i32) -> (i32, i32, i32) {
    %c0_i32 = arith.constant 0 : i32
    %c0_i32_0 = arith.constant 0 : i32
    %c0_i32_1 = arith.constant 0 : i32
    return %arg0, %c0_i32, %c0_i32_0 : i32, i32, i32
  }
  func.func @transform_3(%arg0: i32, %arg1: i32) -> (i32, i32, i32) {
    %c0_i32 = arith.constant 0 : i32
    %c0_i32_0 = arith.constant 0 : i32
    return %arg0, %arg1, %c0_i32 : i32, i32, i32
  }
  func.func @transform_4(%arg0: i32, %arg1: i32) -> (i32, i32, i32) {
    %c0_i32 = arith.constant 0 : i32
    %c0_i32_0 = arith.constant 0 : i32
    return %arg0, %arg1, %c0_i32 : i32, i32, i32
  }
}

module attributes {stable_mosaic.version = 11 : i64} {
  func.func @_sdp_kernel(%arg0: i32, %arg1: i32, %arg2: memref<1x8x32xf32, #tpu.memory_space<vmem>>, %arg3: memref<1x8x32xf32, #tpu.memory_space<vmem>>, %arg4: memref<1x8x32xf32, #tpu.memory_space<vmem>>, %arg5: memref<1x8x32xf32, #tpu.memory_space<vmem>>, %arg6: memref<1x8x8xf32, #tpu.memory_space<vmem>>) attributes {dimension_semantics = [#tpu.dimension_semantics<parallel>, #tpu.dimension_semantics<arbitrary>], iteration_bounds = array<i64: 8, 1>, scalar_prefetch = 0 : i64, scratch_operands = 0 : i64, tpu.core_type = #tpu.core_type<tc>, window_params = [{transform_indices = @transform_0, window_bounds = array<i64: 1, 8, 32>}, {transform_indices = @transform_1, window_bounds = array<i64: 1, 8, 32>}, {transform_indices = @transform_2, window_bounds = array<i64: 1, 8, 32>}, {transform_indices = @transform_3, window_bounds = array<i64: 1, 8, 32>}, {transform_indices = @transform_4, window_bounds = array<i64: 1, 8, 8>}]} {
    %c0 = arith.constant 0 : index
    %c0_0 = arith.constant 0 : index
    %c0_1 = arith.constant 0 : index
    %0 = vector.load %arg2[%c0, %c0_0, %c0_1] : memref<1x8x32xf32, #tpu.memory_space<vmem>>, vector<1x8x32xf32>
    %1 = vector.shape_cast %0 : vector<1x8x32xf32> to vector<8x32xf32>
    %cst = arith.constant 5.000000e-01 : f32
    %2 = vector.broadcast %cst : f32 to vector<8x32xf32>
    %3 = arith.mulf %1, %2 : vector<8x32xf32>
    %c0_2 = arith.constant 0 : index
    %c0_3 = arith.constant 0 : index
    %c0_4 = arith.constant 0 : index
    %4 = vector.load %arg3[%c0_2, %c0_3, %c0_4] : memref<1x8x32xf32, #tpu.memory_space<vmem>>, vector<1x8x32xf32>
    %5 = vector.shape_cast %4 : vector<1x8x32xf32> to vector<8x32xf32>
    %c0_5 = arith.constant 0 : index
    %c0_6 = arith.constant 0 : index
    %c0_7 = arith.constant 0 : index
    %6 = vector.load %arg4[%c0_5, %c0_6, %c0_7] : memref<1x8x32xf32, #tpu.memory_space<vmem>>, vector<1x8x32xf32>
    %7 = vector.shape_cast %6 : vector<1x8x32xf32> to vector<8x32xf32>
    %cst_8 = arith.constant dense<0.000000e+00> : vector<8x8xf32>
    %8 = tpu.matmul %3, %5, %cst_8 {dimension_numbers = #tpu.dot_dimension_numbers<[1], [1], [0], [0], [0, 0, 1, 0], [], []>} : vector<8x32xf32>, vector<8x32xf32>, vector<8x8xf32> -> vector<8x8xf32>
    %cst_9 = arith.constant dense<0xFF800000> : vector<8xf32>
    %9 = vector.multi_reduction <maximumf>, %8, %cst_9 [1] : vector<8x8xf32> to vector<8xf32>
    %10 = vector.shape_cast %9 : vector<8xf32> to vector<8x1xf32>
    %11 = vector.broadcast %10 : vector<8x1xf32> to vector<8x8xf32>
    %12 = arith.subf %8, %11 : vector<8x8xf32>
    %13 = math.exp %12 : vector<8x8xf32>
    %cst_10 = arith.constant dense<0.000000e+00> : vector<8xf32>
    %14 = vector.multi_reduction <add>, %13, %cst_10 [1] : vector<8x8xf32> to vector<8xf32>
    %15 = vector.shape_cast %14 : vector<8xf32> to vector<8x1xf32>
    %16 = tpu.reciprocal %15 : vector<8x1xf32> -> vector<8x1xf32>
    %cst_11 = arith.constant dense<0.000000e+00> : vector<8x32xf32>
    %17 = tpu.matmul %13, %7, %cst_11 {dimension_numbers = #tpu.dot_dimension_numbers<[1], [0], [0], [1], [0, 0, 1, 1], [], []>} : vector<8x8xf32>, vector<8x32xf32>, vector<8x32xf32> -> vector<8x32xf32>
    %18 = vector.broadcast %16 : vector<8x1xf32> to vector<8x32xf32>
    %19 = arith.mulf %17, %18 : vector<8x32xf32>
    %20 = vector.broadcast %16 : vector<8x1xf32> to vector<8x8xf32>
    %21 = arith.mulf %13, %20 : vector<8x8xf32>
    %c0_12 = arith.constant 0 : index
    %c0_13 = arith.constant 0 : index
    %c0_14 = arith.constant 0 : index
    %22 = vector.load %arg6[%c0_12, %c0_13, %c0_14] : memref<1x8x8xf32, #tpu.memory_space<vmem>>, vector<1x8x8xf32>
    %23 = vector.shape_cast %22 : vector<1x8x8xf32> to vector<8x8xf32>
    %24 = vector.shape_cast %21 : vector<8x8xf32> to vector<1x8x8xf32>
    tpu.vector_store %arg6[%c0_12, %c0_13, %c0_14], %24 {strides = array<i32>} : memref<1x8x8xf32, #tpu.memory_space<vmem>>, vector<1x8x8xf32>,
    %c0_15 = arith.constant 0 : index
    %c0_16 = arith.constant 0 : index
    %c0_17 = arith.constant 0 : index
    %25 = vector.load %arg5[%c0_15, %c0_16, %c0_17] : memref<1x8x32xf32, #tpu.memory_space<vmem>>, vector<1x8x32xf32>
    %26 = vector.shape_cast %25 : vector<1x8x32xf32> to vector<8x32xf32>
    %27 = vector.shape_cast %19 : vector<8x32xf32> to vector<1x8x32xf32>
    tpu.vector_store %arg5[%c0_15, %c0_16, %c0_17], %27 {strides = array<i32>} : memref<1x8x32xf32, #tpu.memory_space<vmem>>, vector<1x8x32xf32>,
    return
  }
  func.func @transform_0(%arg0: i32, %arg1: i32) -> (i32, i32, i32) {
    %c0_i32 = arith.constant 0 : i32
    %c0_i32_0 = arith.constant 0 : i32
    return %arg0, %arg1, %c0_i32 : i32, i32, i32
  }
  func.func @transform_1(%arg0: i32, %arg1: i32) -> (i32, i32, i32) {
    %c0_i32 = arith.constant 0 : i32
    %c0_i32_0 = arith.constant 0 : i32
    %c0_i32_1 = arith.constant 0 : i32
    return %arg0, %c0_i32, %c0_i32_0 : i32, i32, i32
  }
  func.func @transform_2(%arg0: i32, %arg1: i32) -> (i32, i32, i32) {
    %c0_i32 = arith.constant 0 : i32
    %c0_i32_0 = arith.constant 0 : i32
    %c0_i32_1 = arith.constant 0 : i32
    return %arg0, %c0_i32, %c0_i32_0 : i32, i32, i32
  }
  func.func @transform_3(%arg0: i32, %arg1: i32) -> (i32, i32, i32) {
    %c0_i32 = arith.constant 0 : i32
    %c0_i32_0 = arith.constant 0 : i32
    return %arg0, %arg1, %c0_i32 : i32, i32, i32
  }
  func.func @transform_4(%arg0: i32, %arg1: i32) -> (i32, i32, i32) {
    %c0_i32 = arith.constant 0 : i32
    %c0_i32_0 = arith.constant 0 : i32
    return %arg0, %arg1, %c0_i32 : i32, i32, i32
  }
}

</mosaic_0001>

<bundles_post_ra>
// kernel: tpu_custom_call.1
= control target key start
LH: loop header
LB: loop body
LE: loop exit
PB: predicated region body
PF: predicated region fallthrough
CT: control target
= control target key end

     0   :  { %10 = vsyncpa [#allocation3], 0  ;;  %s1271_s0 = inlined_call_operand.hbm [shape: f32[8,8,32], index: 0, kind: input, shape index: {}]   ;;  %s1272_s1 = inlined_call_operand.hbm [shape: f32[8,8,32], index: 1, kind: input, shape index: {}]   ;;  %s1273_s2 = inlined_call_operand.hbm [shape: f32[8,8,32], index: 2, kind: input, shape index: {}]   ;;  %s1274_s3 = inlined_call_operand.hbm [shape: f32[8,8,32], index: 3, kind: output, shape index: {0}]   ;;  %s1275_s4 = inlined_call_operand.hbm [shape: f32[8,8,8], index: 4, kind: output, shape index: {1}]  }
   0x1   :  { %12 = vsyncpa [#allocation3 + $0x1], 0 }
   0x2   :  { %13 = vsyncpa [#allocation6], 0 }
   0x3   :  { %14 = vsyncpa [#allocation4], 0 }
   0x4   :  { %16 = vsyncpa [#allocation4 + $0x1], 0 }
   0x5   :  { %17 = vsyncpa [#allocation10], 0 }
   0x6   :  { %19 = vsyncpa [#allocation10 + $0x1], 0  ;;  %s984_s15 = smov 0   ;;  %s986_s16 = smov 0  }
   0x7   :  { %s988_s17 = smov 0   ;;  %s990_s18 = smov 0  }
   0x8   :  { %s992_s19 = smov 0   ;;  %s994_s20 = smov 0  }
   0x9 LB: > { %s621_s21 = sadd.s32 4294967295, %s950_s20   ;;  %s622_s22 = sadd.s32 4294967294, %s950_s20   ;;  %s950_s20 = sphi %s994_s20, %s25_s20   ;;  %s946_s19 = sphi %s992_s19, %s1294_s19   ;;  %s942_s18 = sphi %s990_s18, %s1293_s18   ;;  %s938_s17 = sphi %s988_s17, %s1292_s17   ;;  %s934_s16 = sphi %s986_s16, %s1291_s16   ;;  %s930_s15 = sphi %s984_s15, %s1290_s15  }
   0xa   : > { %p59_p0 = scmp.ne.s32.totalorder %s934_s16, %s930_s15  ;;  %p60_p1 = scmp.eq.s32.totalorder %s621_s21, 0 }
   0xb   : > { %p1016_p2 = scmp.eq.s32.totalorder %s621_s21, 7  ;;  %p143_p3 = scmp.eq.s32.totalorder %s622_s22, 7 }
   0xc   : > { %p1020_p4 = por %p60_p1, %p59_p0  ;;  %p623_p5 = scmp.ge.s32.totalorder %s950_s20, 1 }
   0xd   : > { %s1279_s23 = scalar_select %p1016_p2, 1, 0 }
   0xe   : > { %s1280_s24 = scalar_select %p1020_p4, 1, 0 }
   0xf   : > { %p1025_p6 = por %p143_p3, %p59_p0  ;;  %p178_p7 = scmp.lt.s32.totalorder %s950_s20, 9 }
  0x10   : > { %s1030_s26 = sshll.u32 %s942_s18, 7  ;;  %s952_s5 = smov [#allocation5]  }
  0x11   : > { %s1281_s25 = scalar_select %p1025_p6, 1, 0 }
  0x12   : > { %p1032_p8 = pnand %p623_p5, %p178_p7  ;;  %s1040_s30 = scalar_lea.hbm %s1272_s1, %s1030_s26 }
  0x13   : > { %s193_s6 = sshll.u32 %s952_s5, 4  ;;  %s1048_s9 = scalar_lea.hbm %s1273_s2, %s1030_s26  ;;  %s194_s6 = int_to_ptr.vmem [resolvable:$true] %s193_s6 }
  0x14   : > { %s1282_s27 = scalar_select %p1032_p8, 1, 0 }
  0x15   : > { %p666_p9 = pneg %p1032_p8  ;;  %s953_s11 = smov [#allocation7]  }
  0x16   : > { %s206_s12 = sshll.u32 %s953_s11, 4  ;;  %s742_s13 = scalar_lea.hbm %s1040_s30, 128  ;;  %s1056_s12 = int_to_ptr.vmem [resolvable:$true] %s206_s12 }
  0x17   : > { %p1052_p10 = pnand %p666_p9, %p1020_p4  ;;  %p743_p11 = scmp.ne.s32.totalorder %s1040_s30, %s742_s13 }
  0x18   : > { %s747_s21 = scalar_lea.hbm %s1272_s1, 1024  ;;  %p748_p1 = scmp.lt.u32.totalorder %s1040_s30, %s1272_s1 }
  0x19   : > { %p744_p12 = pneg %p1052_p10  ;;  %p749_p3 = scmp.lt.u32.totalorder %s747_s21, %s742_s13 }
  0x1a   : > { %p751_p7 = scmp.lt.u32.totalorder %s742_s13, %s1040_s30 }
  0x1b   : > { %p745_p13 = pnand %p744_p12, %p743_p11  ;;  %p750_p5 = por %p749_p3, %p748_p1 }
  0x1d   : > { %p746_p0 = pneg %p745_p13  ;;  %p752_p9 = por %p751_p7, %p750_p5 }
  0x1f   : > { %p753_p6 = pnand %p752_p9, %p746_p0 }
  0x21   : > { %756 = shalt.err (!%p753_p6)
}
  0x22   : > { %s757_s29 = scalar_lea.vmem %s194_s6, 128  ;;  %p765_p8 = scmp.lt.s32.totalorder %s194_s6, %s194_s6 }
  0x23   : > { %p758_p4 = scmp.ne.s32.totalorder %s194_s6, %s757_s29  ;;  %p766_p2 = scmp.lt.s32.totalorder %s757_s29, %s757_s29 }
  0x25   : > { %p760_p11 = pnand %p758_p4, %p744_p12  ;;  %p767_p1 = por %p766_p2, %p765_p8 }
  0x27   : > { %p761_p13 = pneg %p760_p11 }
  0x29   : > { %p768_p3 = pnand %p767_p1, %p761_p13 }
  0x2b   : > { %771 = shalt.err (!%p768_p3)
}
  0x2c   : > { %669 = dma.hbm_to_vmem [thread:$0]  (!%p1052_p10), %s1040_s30, 128, %s194_s6, [#allocation6]  }
  0x2d   : > { %s772_s5 = scalar_lea.hbm %s1048_s9, 128  ;;  %s777_s11 = scalar_lea.hbm %s1273_s2, 1024 }
  0x2e   : > { %p773_p6 = scmp.ne.s32.totalorder %s1048_s9, %s772_s5  ;;  %p778_p2 = scmp.lt.u32.totalorder %s1048_s9, %s1273_s2 }
  0x2f   : > { %p779_p8 = scmp.lt.u32.totalorder %s777_s11, %s772_s5  ;;  %p781_p7 = scmp.lt.u32.totalorder %s772_s5, %s1048_s9 }
  0x30   : > { %p775_p4 = pnand %p773_p6, %p744_p12 }
  0x31   : > { %p780_p5 = por %p779_p8, %p778_p2 }
  0x32   : > { %p776_p0 = pneg %p775_p4 }
  0x33   : > { %p782_p9 = por %p781_p7, %p780_p5 }
  0x35   : > { %p783_p11 = pnand %p782_p9, %p776_p0 }
  0x37   : > { %786 = shalt.err (!%p783_p11)
}
  0x38   : > { %s787_s30 = scalar_lea.vmem %s1056_s12, 128  ;;  %p795_p6 = scmp.lt.s32.totalorder %s1056_s12, %s1056_s12 }
  0x39   : > { %p788_p13 = scmp.ne.s32.totalorder %s1056_s12, %s787_s30  ;;  %p796_p4 = scmp.lt.s32.totalorder %s787_s30, %s787_s30 }
  0x3b   : > { %p790_p1 = pnand %p788_p13, %p744_p12  ;;  %p797_p2 = por %p796_p4, %p795_p6 }
  0x3d   : > { %p791_p3 = pneg %p790_p1 }
  0x3f   : > { %p798_p8 = pnand %p797_p2, %p791_p3 }
  0x41   : > { %801 = shalt.err (!%p798_p8)
}
  0x42   : > { %672 = dma.hbm_to_vmem [thread:$0]  (!%p1052_p10), %s1048_s9, 128, %s1056_s12, [#allocation6]  }
  0x43   : > { %s37_s6 = sadd.s32 1, %s946_s19  ;;  %s46_s18 = sadd.s32 1, %s938_s17 }
  0x44   : > { %p39_p12 = scmp.ge.s32.totalorder %s37_s6, 8  ;;  %p53_p0 = scmp.ne.s32.totalorder %s938_s17, %s934_s16 }
  0x45   : > { %p54_p5 = scmp.eq.s32.totalorder %s950_s20, 0  ;;  %p684_p7 = scmp.lt.s32.totalorder %s950_s20, 8 }
  0x46   : > { %s1296_s6 = smov (%p39_p12, %s37_s6), 0  ;;  %p1284_p11 = scmp.ne.s32.totalorder %s1279_s23, 0 }
  0x47   : > { %p55_p9 = por %p54_p5, %p53_p0  ;;  %s41_s21 = ssub.s32 %s946_s19, %s1296_s6 }
  0x48   : > { %p1113_p13 = por %p1284_p11, %p53_p0  ;;  %s217_s22 = sand.u32 1, %s938_s17  }
  0x49   : > { %p44_p1 = scmp.eq.s32.totalorder %s41_s21, 0  ;;  %s627_s9 = sshll.u32 %s217_s22, 3 }
  0x4a   : > { %s628_s12 = sshll.u32 %s946_s19, 7  ;;  %s221_s23 = scalar_lea.vmem [#allocation2], %s627_s9 }
  0x4b   : > { %s1122_s28 = scalar_select %p44_p1, %s938_s17, %s46_s18  }
  0x4c   : > { %s1127_s7 = scalar_lea.hbm %s1271_s0, %s628_s12  ;;  %s229_s8 = sshll.u32 %s221_s23, 4  ;;  %s1135_s8 = int_to_ptr.vmem [resolvable:$true] %s229_s8 }
  0x4d   : > { %p1131_p10 = pnand %p684_p7, %p55_p9  ;;  %s218_s13 = scalar_lea.sflag [#allocation3], %s217_s22 }
  0x4e   : > { %s802_s14 = scalar_lea.hbm %s1127_s7, 128  ;;  %s807_s21 = scalar_lea.hbm %s1271_s0, 1024 }
  0x4f   : > { %p803_p3 = scmp.ne.s32.totalorder %s1127_s7, %s802_s14  ;;  %p804_p6 = pneg %p1131_p10 }
  0x50   : > { %p808_p8 = scmp.lt.u32.totalorder %s1127_s7, %s1271_s0  ;;  %p809_p12 = scmp.lt.u32.totalorder %s807_s21, %s802_s14 }
  0x51   : > { %p805_p4 = pnand %p804_p6, %p803_p3  ;;  %p811_p5 = scmp.lt.u32.totalorder %s802_s14, %s1127_s7 }
  0x52   : > { %p810_p0 = por %p809_p12, %p808_p8 }
  0x53   : > { %p806_p2 = pneg %p805_p4 }
  0x54   : > { %p812_p7 = por %p811_p5, %p810_p0 }
  0x56   : > { %p813_p9 = pnand %p812_p7, %p806_p2 }
  0x58   : > { %816 = shalt.err (!%p813_p9)
}
  0x59   : > { %s817_s22 = scalar_lea.vmem %s1135_s8, 128  ;;  %s954_s29 = smov [#allocation2]  }
  0x5a   : > { %p818_p11 = scmp.ne.s32.totalorder %s1135_s8, %s817_s22  ;;  %s822_s5 = sshll.u32 %s954_s29, 4  ;;  %s823_s5 = int_to_ptr.vmem [resolvable:$false] %s822_s5 }
  0x5b   : > { %s824_s23 = scalar_lea.vmem %s823_s5, 256  ;;  %p825_p4 = scmp.lt.s32.totalorder %s1135_s8, %s823_s5 }
  0x5c   : > { %p820_p1 = pnand %p818_p11, %p804_p6  ;;  %p826_p8 = scmp.lt.s32.totalorder %s824_s23, %s817_s22 }
  0x5e   : > { %p821_p3 = pneg %p820_p1  ;;  %p827_p12 = por %p826_p8, %p825_p4 }
  0x60   : > { %p828_p0 = pnand %p827_p12, %p821_p3 }
  0x62   : > { %831 = shalt.err (!%p828_p0)
}
  0x63   : > { %676 = dma.hbm_to_vmem [thread:$0]  (!%p1131_p10), %s1127_s7, 128, %s1135_s8, %s218_s13  }
  0x64   : > { %p1287_p2 = scmp.ne.s32.totalorder %s1282_s27, 0 }
  0x65   : > { %s1165_s14 = sand.u32 (!%p1287_p2), 1, %s934_s16   ;;  %p1288_p6 = scmp.ne.s32.totalorder (!%p1287_p2), %s1280_s24, 0 }
  0x66   : > { %238 = sbr.rel (%p1287_p2) target bundleno = 716 (0x2cc), region = 32  ;;  %s1168_s30 = sshll.u32 (!%p1287_p2), %s1165_s14, 3 }
  0x67   : > { %s241_s18 = scalar_lea.sflag (!%p1287_p2), [#allocation3], %s1165_s14  ;;  %s244_s21 = scalar_lea.vmem (!%p1287_p2), [#allocation2], %s1168_s30 }
  0x6d   : > { %913 = dma.done.wait (%p1288_p6), %s241_s18, 128  }
  0x6e   : > { %915 = vsyncadd (%p1288_p6), %s241_s18, 4294967168 }
  0x6f   : > { %917 = dma.done.wait (%p1288_p6), [#allocation6], 256  }
  0x70   : > { %919 = vsyncadd (%p1288_p6), [#allocation6], 4294967040  ;;  %v955_v0 = vmov 0.0   ;;  %vm956_vm0 = vmmov 0   ;;  %vm286_vm1 = vcmask 261120   ;;  %v284_v1 = vld [vmem:[#allocation5] sm:$0xff]  ;;  %s1190_s11 = scalar_lea.hbm %s1275_s4, %s1030_s26 }
  0x71   : > { %646 = vmatprep.subr.mxu0 %v955_v0  ;;  %648 = vmatprep.mubr.msk.f32.mxu0 %vm956_vm0, %v955_v0  ;;  %v282_v2 = vld [vmem:[%s244_s21] sm:$0xff]  ;;  %vm363_vm2 = vcmask 64512   ;;  %v285_v7 = vld [vmem:[#allocation7] sm:$0xff]  ;;  %s281_s24 = scalar_lea.vmem [#allocation9], %s1168_s30  ;;  %s457_s13 = scalar_lea.sflag [#allocation10], %s1165_s14 }
  0x72   : > { %651 = vmatprep.subr.mxu1 %v955_v0  ;;  %653 = vmatprep.mubr.msk.f32.mxu1 %vm956_vm0, %v955_v0  ;;  %v283_v3 = vmul.f32 0.5, %v282_v2  ;;  %s485_s27 = sshll.u32 %s281_s24, 4  ;;  %s957_s12 = smov [#allocation9]   ;;  %s1192_s27 = int_to_ptr.vmem [resolvable:$true] %s485_s27 }
  0x73   : > { %647 = vmatpush3.xpose.msk.msra.mxu0 %vm286_vm1, %v284_v1  ;;  %652 = vmatpush3.msra.mxu1 %v285_v7  ;;  %s832_s9 = scalar_lea.vmem %s1192_s27, 128  ;;  %s836_s22 = sshll.u32 %s957_s12, 4  ;;  %s837_s22 = int_to_ptr.vmem [resolvable:$false] %s836_s22 }
  0x74   : > { %p833_p10 = scmp.ne.s32.totalorder %s1192_s27, %s832_s9  ;;  %s838_s29 = scalar_lea.vmem %s837_s22, 256 }
  0x75   : > { %p839_p9 = scmp.lt.s32.totalorder %s1192_s27, %s837_s22  ;;  %p840_p11 = scmp.lt.s32.totalorder %s838_s29, %s832_s9 }
  0x76   : > { %649 = vmatmul.mubr.msk.f32.vlgmr.msra.gmra.mrb[0].mxu0 %vm286_vm1, %v283_v3  ;;  %p834_p5 = pnand %p833_p10, %p1113_p13 }
  0x77   : > { %p841_p1 = por %p840_p11, %p839_p9 }
  0x78   : > { %p835_p7 = pneg %p834_p5 }
  0x7a   : > { %p842_p3 = pnand %p841_p1, %p835_p7 }
 0x149   : > { %v359_v4 = vpop.f32.mrb[0].mxu0 }
 0x14a   : > { %v650_v5 = vpop.f32.mrb[1].mxu0  ;;  %v364_v6 = vsel %vm363_vm2, %v359_v4, -inf }
 0x14b   : > { %365 = vmax.xlane.f32.xlu0 %v364_v6 }
 0x1d8   : > { %v366_v8 = vpop.xlane.xlu0 %365 }
 0x1d9   : > { %v367_v9 = vsub.f32 %v359_v4, %v366_v8 }
 0x1db   : > { %v368_v10 = vmul.f32 1.442695, %v367_v9 }
 0x1dd   : > { %738 = vpow2.f32 %v368_v10 }
 0x1e7   : > { %v739_v11 = vpop.eup %738 }
 0x1e8   : > { %654 = vmatmul.mubr.msk.f32.vlgmr.msra.gmra.mrb[0].mxu1 %vm363_vm2, %v739_v11  ;;  %v370_v12 = vsel %vm363_vm2, %v739_v11, 0.0 }
 0x1e9   : > { %371 = vadd.xlane.f32.xlu0 %v370_v12 }
 0x276   : > { %v372_v13 = vpop.xlane.xlu0 %371 }
 0x277   : > { %740 = vrcp.f32 %v372_v13 }
 0x281   : > { %v741_v14 = vpop.eup %740 }
 0x282   : > { %v448_v15 = vmul.f32 %v741_v14, %v739_v11 }
 0x284   : > { %449 = vst.msk [vmem:[%s281_s24] sm:$0xff] %vm363_vm2, %v448_v15 }
 0x285   : > { %845 = shalt.err (!%p842_p3)
}
 0x286   : > { %s846_s5 = scalar_lea.hbm %s1190_s11, 128  ;;  %s850_s21 = scalar_lea.hbm %s1275_s4, 1024 }
 0x287   : > { %p847_p4 = scmp.ne.s32.totalorder %s1190_s11, %s846_s5  ;;  %p851_p0 = scmp.lt.u32.totalorder %s1190_s11, %s1275_s4 }
 0x288   : > { %p852_p2 = scmp.lt.u32.totalorder %s850_s21, %s846_s5  ;;  %p854_p10 = scmp.lt.u32.totalorder %s846_s5, %s1190_s11 }
 0x289   : > { %p848_p8 = pnand %p847_p4, %p1113_p13 }
 0x28a   : > { %p853_p6 = por %p852_p2, %p851_p0 }
 0x28b   : > { %p849_p12 = pneg %p848_p8 }
 0x28c   : > { %p855_p5 = por %p854_p10, %p853_p6 }
 0x28e   : > { %p856_p7 = pnand %p855_p5, %p849_p12 }
 0x290   : > { %859 = shalt.err (!%p856_p7)
}
 0x291   : > { %663 = dma.vmem_to_hbm [thread:$0]  (%p1113_p13), %s1192_s27, 128, %s1190_s11, %s457_s13  }
 0x292   : > { %s274_s8 = scalar_lea.vmem [#allocation8], %s1168_s30  ;;  %s1222_s29 = scalar_lea.hbm %s1274_s3, %s1030_s26 }
 0x293   : > { %s471_s9 = sshll.u32 %s274_s8, 4  ;;  %s452_s5 = scalar_lea.sflag [#allocation4], %s1165_s14  ;;  %s1224_s9 = int_to_ptr.vmem [resolvable:$true] %s471_s9 }
 0x294   : > { %s860_s23 = scalar_lea.vmem %s1224_s9, 128  ;;  %s958_s30 = smov [#allocation8]  }
 0x295   : > { %p861_p9 = scmp.ne.s32.totalorder %s1224_s9, %s860_s23  ;;  %s864_s27 = sshll.u32 %s958_s30, 4  ;;  %s865_s27 = int_to_ptr.vmem [resolvable:$false] %s864_s27 }
 0x296   : > { %s866_s11 = scalar_lea.vmem %s865_s27, 256  ;;  %p867_p3 = scmp.lt.s32.totalorder %s1224_s9, %s865_s27 }
 0x297   : > { %p862_p11 = pnand %p861_p9, %p1113_p13  ;;  %p868_p4 = scmp.lt.s32.totalorder %s866_s11, %s860_s23 }
 0x299   : > { %p863_p1 = pneg %p862_p11  ;;  %p869_p8 = por %p868_p4, %p867_p3 }
 0x29b   : > { %p870_p12 = pnand %p869_p8, %p863_p1 }
 0x2bb   : > { %v443_v16 = vpop.f32.mrb[0].mxu1 }
 0x2bc   : > { %v447_v17 = vmul.f32 %v741_v14, %v443_v16  ;;  %v655_v18 = vpop.f32.mrb[1].mxu1 }
 0x2be   : > { %450 = vst.msk [vmem:[%s274_s8] sm:$0xff] %vm286_vm1, %v447_v17 }
 0x2bf   : > { %873 = shalt.err (!%p870_p12)
}
 0x2c0   : > { %s874_s26 = scalar_lea.hbm %s1222_s29, 128  ;;  %s878_s18 = scalar_lea.hbm %s1274_s3, 1024 }
 0x2c1   : > { %p875_p0 = scmp.ne.s32.totalorder %s1222_s29, %s874_s26  ;;  %p879_p10 = scmp.lt.u32.totalorder %s1222_s29, %s1274_s3 }
 0x2c2   : > { %p880_p5 = scmp.lt.u32.totalorder %s878_s18, %s874_s26  ;;  %p882_p9 = scmp.lt.u32.totalorder %s874_s26, %s1222_s29 }
 0x2c3   : > { %p876_p2 = pnand %p875_p0, %p1113_p13 }
 0x2c4   : > { %p881_p7 = por %p880_p5, %p879_p10 }
 0x2c5   : > { %p877_p6 = pneg %p876_p2 }
 0x2c6   : > { %p883_p11 = por %p882_p9, %p881_p7 }
 0x2c8   : > { %p884_p1 = pnand %p883_p11, %p877_p6 }
 0x2ca   : > { %887 = shalt.err (!%p884_p1)
}
 0x2cb   : > { %662 = dma.vmem_to_hbm [thread:$0]  (%p1113_p13), %s1224_s9, 128, %s1222_s29, %s452_s5  }
 0x2cc PF: > { %p685_p3 = scmp.ge.s32.totalorder %s950_s20, 2  ;;  %s497_s7 = sand.u32 1, %s930_s15  }
 0x2cd   : > { %p1289_p4 = scmp.ne.s32.totalorder %s1281_s25, 0  ;;  %s498_s8 = scalar_lea.sflag [#allocation4], %s497_s7 }
 0x2cf   : > { %p678_p8 = pnand %p685_p3, %p1289_p4 }
 0x2d1   : > { %921 = dma.done.wait (!%p678_p8), %s498_s8, 128  }
 0x2d2   : > { %923 = vsyncadd (!%p678_p8), %s498_s8, 4294967168  ;;  %s507_s12 = scalar_lea.sflag [#allocation10], %s497_s7 }
 0x2d3   : > { %925 = dma.done.wait (!%p678_p8), %s507_s12, 128  }
 0x2d4   : > { %927 = vsyncadd (!%p678_p8), %s507_s12, 4294967168  ;;  %s25_s20 = sadd.s32 1, %s950_s20   ;;  %s1290_s15 = smov %s934_s16 }
 0x2d5   : > { %p22_p12 = scmp.ge.s32.totalorder %s25_s20, 10   ;;  %s1291_s16 = smov %s938_s17 }
 0x2d6   : > { %s1292_s17 = smov %s1122_s28  ;;  %s1293_s18 = smov %s946_s19 }
 0x2d7   : > { %s1294_s19 = smov %s1296_s6  ;;  %24 = sbr.rel (!%p22_p12) target bundleno = 9 (0x9), region = 104 }
 0x2de   :  { %512 = vsyncpa [#allocation3], 1 }
 0x2df   :  { %514 = vsyncpa [#allocation3 + $0x1], 1 }
 0x2e0   :  { %515 = vsyncpa [#allocation6], 1 }
 0x2e1   :  { %516 = vsyncpa [#allocation4], 1 }
 0x2e2   :  { %518 = vsyncpa [#allocation4 + $0x1], 1 }
 0x2e3   :  { %519 = vsyncpa [#allocation10], 1 }
 0x2e4   :  { %521 = vsyncpa [#allocation10 + $0x1], 1 }

// kernel: tpu_custom_call.1
= control target key start
LH: loop header
LB: loop body
LE: loop exit
PB: predicated region body
PF: predicated region fallthrough
CT: control target
= control target key end

     0   :  { %s1340_s0 = inlined_call_operand.hbm [shape: f32[8,8,32], index: 0, kind: input, shape index: {}]   ;;  %s1341_s1 = inlined_call_operand.hbm [shape: f32[8,8,32], index: 1, kind: input, shape index: {}]   ;;  %s1342_s2 = inlined_call_operand.hbm [shape: f32[8,8,32], index: 2, kind: input, shape index: {}]   ;;  %s1343_s3 = inlined_call_operand.hbm [shape: f32[8,8,32], index: 3, kind: output, shape index: {0}]   ;;  %s1344_s4 = inlined_call_operand.hbm [shape: f32[8,8,8], index: 4, kind: output, shape index: {1}]  }
   0x1   :  { %1352 = sst [smem:[#allocation19_spill]] %s1341_s1 }
   0x2   :  { %10 = vsyncpa [#allocation3], 0 }
   0x3   :  { %12 = vsyncpa [#allocation3 + $0x1], 0 }
   0x4   :  { %13 = vsyncpa [#allocation6], 0 }
   0x5   :  { %15 = vsyncpa [#allocation6 + $0x1], 0 }
   0x6   :  { %16 = vsyncpa [#allocation4], 0 }
   0x7   :  { %18 = vsyncpa [#allocation4 + $0x1], 0 }
   0x8   :  { %19 = vsyncpa [#allocation10], 0 }
   0x9   :  { %21 = vsyncpa [#allocation10 + $0x1], 0  ;;  %s1037_s15 = smov 0   ;;  %s1039_s16 = smov 0  }
   0xa   :  { %s1041_s17 = smov 0   ;;  %s1043_s18 = smov 0  }
   0xb   :  { %s1045_s19 = smov 0   ;;  %s1047_s20 = smov 0  }
   0xc LB: > { %1353 = sst [smem:[#allocation15_spill]] %s999_s19  ;;  %s1068_s21 = sadd.s32 4294967295, %s1003_s20   ;;  %s1003_s20 = sphi %s1047_s20, %s27_s20   ;;  %s999_s19 = sphi %s1045_s19, %s1376_s19   ;;  %s995_s18 = sphi %s1043_s18, %s1375_s18   ;;  %s991_s17 = sphi %s1041_s17, %s1379_s17   ;;  %s987_s16 = sphi %s1039_s16, %s1378_s16   ;;  %s983_s15 = sphi %s1037_s15, %s1377_s15  }
   0xd   : > { %s674_s22 = sadd.s32 4294967294, %s1003_s20   ;;  %s39_s23 = sadd.s32 1, %s999_s19 }
   0xe   : > { %s48_s24 = sadd.s32 1, %s991_s17  ;;  %p41_p0 = scmp.ge.s32.totalorder %s39_s23, 8 }
   0xf   : > { %p55_p1 = scmp.ne.s32.totalorder %s991_s17, %s987_s16  ;;  %p56_p2 = scmp.eq.s32.totalorder %s1003_s20, 0 }
  0x10   : > { %p61_p3 = scmp.ne.s32.totalorder %s987_s16, %s983_s15  ;;  %s1381_s23 = smov (%p41_p0, %s39_s23), 0 }
  0x11   : > { %1354 = sst [smem:[#allocation16_spill]] %s1381_s23  ;;  %p1080_p4 = por %p56_p2, %p55_p1 }
  0x12   : > { %p62_p5 = scmp.eq.s32.totalorder %s1068_s21, 0  ;;  %s43_s26 = ssub.s32 %s999_s19, %s1381_s23 }
  0x13   : > { %p139_p6 = scmp.eq.s32.totalorder %s1068_s21, 7  ;;  %p46_p7 = scmp.eq.s32.totalorder %s43_s26, 0 }
  0x14   : > { %p1088_p8 = por %p62_p5, %p61_p3  ;;  %p145_p10 = scmp.eq.s32.totalorder %s674_s22, 7 }
  0x15   : > { %p1092_p9 = por %p139_p6, %p55_p1  ;;  %p739_p12 = scmp.lt.s32.totalorder %s1003_s20, 8 }
  0x16   : > { %s1356_s27 = scalar_select %p1088_p8, 1, 0 }
  0x17   : > { %s1357_s28 = scalar_select %p1092_p9, 1, 0 }
  0x18   : > { %s1097_s29 = scalar_select %p46_p7, %s991_s17, %s48_s24  }
  0x19   : > { %p1099_p11 = por %p145_p10, %p61_p3  ;;  %s1345_s5 = sand.u32 1, %s991_s17  }
  0x1a   : > { %1358 = sst [smem:[#allocation17_spill]] %s1097_s29  ;;  %s1107_s6 = sshll.u32 %s1345_s5, 3 }
  0x1b   : > { %s1359_s30 = scalar_select %p1099_p11, 1, 0 }
  0x1c   : > { %s1110_s7 = sshll.u32 %s999_s19, 7  ;;  %p1114_p13 = pnand %p739_p12, %p1080_p4 }
  0x1d   : > { %1360 = sst [smem:[#allocation18_spill]] %s1359_s30  ;;  %s212_s9 = sand.u32 1, %s1003_s20  }
  0x1e   : > { %s1361_s8 = scalar_select %p1114_p13, 1, 0 }
  0x1f   : > { %s1362_s1 = sld [smem:[#allocation19_spill]]  ;;  %s216_s13 = scalar_lea.vmem [#allocation5], %s1107_s6 }
  0x20   : > { %s223_s14 = sshll.u32 %s216_s13, 4  ;;  %s1130_s22 = scalar_lea.sflag [#allocation6], %s212_s9  ;;  %s1127_s14 = int_to_ptr.vmem [resolvable:$true] %s223_s14 }
  0x21   : > { %p1136_p3 = pneg %p1114_p13 }
  0x25   : > { %s1123_s12 = scalar_lea.hbm %s1362_s1, %s1110_s7  ;;  %s800_s11 = scalar_lea.hbm %s1362_s1, 1024 }
  0x26   : > { %s795_s24 = scalar_lea.hbm %s1123_s12, 128  ;;  %p801_p6 = scmp.lt.u32.totalorder %s1123_s12, %s1362_s1 }
  0x27   : > { %p796_p2 = scmp.ne.s32.totalorder %s1123_s12, %s795_s24  ;;  %p802_p7 = scmp.lt.u32.totalorder %s800_s11, %s795_s24 }
  0x28   : > { %p804_p12 = scmp.lt.u32.totalorder %s795_s24, %s1123_s12 }
  0x29   : > { %p798_p4 = pnand %p1136_p3, %p796_p2  ;;  %p803_p10 = por %p802_p7, %p801_p6 }
  0x2b   : > { %p799_p5 = pneg %p798_p4  ;;  %p805_p0 = por %p804_p12, %p803_p10 }
  0x2d   : > { %p806_p1 = pnand %p805_p0, %p799_p5 }
  0x2f   : > { %809 = shalt.err (!%p806_p1)
}
  0x30   : > { %s810_s9 = scalar_lea.vmem %s1127_s14, 128  ;;  %s1005_s26 = smov [#allocation5]  }
  0x31   : > { %p811_p2 = scmp.ne.s32.totalorder %s1127_s14, %s810_s9  ;;  %s815_s10 = sshll.u32 %s1005_s26, 4  ;;  %s816_s10 = int_to_ptr.vmem [resolvable:$false] %s815_s10 }
  0x32   : > { %s817_s5 = scalar_lea.vmem %s816_s10, 256  ;;  %p818_p9 = scmp.lt.s32.totalorder %s1127_s14, %s816_s10 }
  0x33   : > { %p813_p4 = pnand %p811_p2, %p1136_p3  ;;  %p819_p8 = scmp.lt.s32.totalorder %s817_s5, %s810_s9 }
  0x35   : > { %p814_p11 = pneg %p813_p4  ;;  %p820_p6 = por %p819_p8, %p818_p9 }
  0x37   : > { %p821_p7 = pnand %p820_p6, %p814_p11 }
  0x39   : > { %824 = shalt.err (!%p821_p7)
}
  0x3a   : > { %728 = dma.hbm_to_vmem [thread:$0]  (!%p1114_p13), %s1123_s12, 128, %s1127_s14, %s1130_s22  }
  0x3b   : > { %p1364_p0 = scmp.lt.s32.totalorder %s1003_s20, 9  ;;  %p1365_p1 = scmp.ge.s32.totalorder %s1003_s20, 1 }
  0x3c   : > { %s1172_s9 = scalar_lea.hbm %s1340_s0, %s1110_s7  ;;  %s197_s26 = scalar_lea.vmem [#allocation2], %s1107_s6 }
  0x3d   : > { %p1164_p5 = pnand %p1365_p1, %p1364_p0  ;;  %s205_s10 = sshll.u32 %s197_s26, 4  ;;  %s1175_s10 = int_to_ptr.vmem [resolvable:$true] %s205_s10 }
  0x3e   : > { %s1181_s5 = scalar_lea.hbm %s1342_s2, %s1110_s7  ;;  %s1367_s1 = sand.u32 1, %s991_s17  }
  0x3f   : > { %s1366_s24 = scalar_select %p1164_p5, 1, 0 }
  0x40   : > { %s194_s23 = scalar_lea.sflag [#allocation3], %s1367_s1  ;;  %s825_s19 = scalar_lea.hbm %s1172_s9, 128 }
  0x41   : > { %p826_p8 = scmp.ne.s32.totalorder %s1172_s9, %s825_s19  ;;  %s830_s29 = scalar_lea.hbm %s1340_s0, 1024 }
  0x42   : > { %p831_p10 = scmp.lt.u32.totalorder %s1172_s9, %s1340_s0  ;;  %p832_p12 = scmp.lt.u32.totalorder %s830_s29, %s825_s19 }
  0x43   : > { %p828_p9 = pnand %p826_p8, %p1136_p3  ;;  %p834_p4 = scmp.lt.u32.totalorder %s825_s19, %s1172_s9 }
  0x44   : > { %p833_p2 = por %p832_p12, %p831_p10 }
  0x45   : > { %p829_p11 = pneg %p828_p9 }
  0x46   : > { %p835_p6 = por %p834_p4, %p833_p2 }
  0x48   : > { %p836_p7 = pnand %p835_p6, %p829_p11 }
  0x4a   : > { %839 = shalt.err (!%p836_p7)
}
  0x4b   : > { %s840_s1 = scalar_lea.vmem %s1175_s10, 128  ;;  %s1006_s7 = smov [#allocation2]  }
  0x4c   : > { %p841_p0 = scmp.ne.s32.totalorder %s1175_s10, %s840_s1  ;;  %s845_s12 = sshll.u32 %s1006_s7, 4  ;;  %s846_s12 = int_to_ptr.vmem [resolvable:$false] %s845_s12 }
  0x4d   : > { %s847_s30 = scalar_lea.vmem %s846_s12, 256  ;;  %p848_p9 = scmp.lt.s32.totalorder %s1175_s10, %s846_s12 }
  0x4e   : > { %p843_p1 = pnand %p841_p0, %p1136_p3  ;;  %p849_p5 = scmp.lt.s32.totalorder %s847_s30, %s840_s1 }
  0x50   : > { %p844_p8 = pneg %p843_p1  ;;  %p850_p10 = por %p849_p5, %p848_p9 }
  0x52   : > { %p851_p12 = pnand %p850_p10, %p844_p8 }
  0x54   : > { %854 = shalt.err (!%p851_p12)
}
  0x55   : > { %725 = dma.hbm_to_vmem [thread:$0]  (!%p1114_p13), %s1172_s9, 128, %s1175_s10, %s194_s23  }
  0x56   : > { %s234_s19 = scalar_lea.vmem [#allocation7], %s1107_s6  ;;  %s855_s14 = scalar_lea.hbm %s1181_s5, 128 }
  0x57   : > { %s241_s29 = sshll.u32 %s234_s19, 4  ;;  %p856_p11 = scmp.ne.s32.totalorder %s1181_s5, %s855_s14  ;;  %s242_s29 = int_to_ptr.vmem [resolvable:$true] %s241_s29 }
  0x58   : > { %s860_s26 = scalar_lea.hbm %s1342_s2, 1024  ;;  %p861_p4 = scmp.lt.u32.totalorder %s1181_s5, %s1342_s2 }
  0x59   : > { %p858_p5 = pnand %p856_p11, %p1136_p3  ;;  %p862_p6 = scmp.lt.u32.totalorder %s860_s26, %s855_s14 }
  0x5a   : > { %p864_p0 = scmp.lt.u32.totalorder %s855_s14, %s1181_s5 }
  0x5b   : > { %p859_p2 = pneg %p858_p5  ;;  %p863_p7 = por %p862_p6, %p861_p4 }
  0x5d   : > { %p865_p1 = por %p864_p0, %p863_p7 }
  0x5f   : > { %p866_p8 = pnand %p865_p1, %p859_p2 }
  0x61   : > { %869 = shalt.err (!%p866_p8)
}
  0x62   : > { %s870_s23 = scalar_lea.vmem %s242_s29, 128  ;;  %s1007_s6 = smov [#allocation7]  }
  0x63   : > { %p871_p9 = scmp.ne.s32.totalorder %s242_s29, %s870_s23  ;;  %s875_s9 = sshll.u32 %s1007_s6, 4  ;;  %s876_s9 = int_to_ptr.vmem [resolvable:$false] %s875_s9 }
  0x64   : > { %s877_s10 = scalar_lea.vmem %s876_s9, 256  ;;  %p878_p11 = scmp.lt.s32.totalorder %s242_s29, %s876_s9 }
  0x65   : > { %p873_p10 = pnand %p871_p9, %p1136_p3  ;;  %p879_p5 = scmp.lt.s32.totalorder %s877_s10, %s870_s23 }
  0x67   : > { %p874_p12 = pneg %p873_p10  ;;  %p880_p13 = por %p879_p5, %p878_p11 }
  0x69   : > { %p881_p4 = pnand %p880_p13, %p874_p12 }
  0x6b   : > { %884 = shalt.err (!%p881_p4)
}
  0x6c   : > { %p1368_p6 = scmp.ne.s32.totalorder %s1361_s8, 0  ;;  %p1369_p2 = scmp.ne.s32.totalorder %s1366_s24, 0 }
  0x6d   : > { %s1228_s25 = sand.u32 (!%p1369_p2), 1, %s987_s16   ;;  %p1370_p13 = scmp.ne.s32.totalorder (!%p1369_p2), %s1356_s27, 0 }
  0x6e   : > { %731 = dma.hbm_to_vmem [thread:$0]  (!%p1368_p6), %s1181_s5, 128, %s242_s29, %s1130_s22  }
  0x6f   : > { %250 = sbr.rel (%p1369_p2) target bundleno = 726 (0x2d6), region = 32  ;;  %s1231_s12 = sshll.u32 (!%p1369_p2), %s1228_s25, 3 }
  0x70   : > { %s253_s30 = scalar_lea.sflag (!%p1369_p2), [#allocation3], %s1228_s25  ;;  %s256_s19 = scalar_lea.vmem (!%p1369_p2), [#allocation2], %s1231_s12 }
  0x76   : > { %966 = dma.done.wait (%p1370_p13), %s253_s30, 128  }
  0x77   : > { %968 = vsyncadd (%p1370_p13), %s253_s30, 4294967168  ;;  %s261_s8 = sand.u32 1, %s1068_s21   ;;  %s265_s24 = scalar_lea.vmem [#allocation5], %s1231_s12 }
  0x78   : > { %s262_s22 = scalar_lea.sflag [#allocation6], %s261_s8 }
  0x79   : > { %970 = dma.done.wait (%p1370_p13), %s262_s22, 256  }
  0x7a   : > { %972 = vsyncadd (%p1370_p13), %s262_s22, 4294967040  ;;  %v1008_v0 = vmov 0.0   ;;  %vm1009_vm0 = vmmov 0   ;;  %vm318_vm1 = vcmask 261120   ;;  %v316_v1 = vld [vmem:[%s265_s24] sm:$0xff]  ;;  %v314_v2 = vld [vmem:[%s256_s19] sm:$0xff] }
  0x7b   : > { %702 = vmatprep.subr.mxu0 %v1008_v0  ;;  %704 = vmatprep.mubr.msk.f32.mxu0 %vm1009_vm0, %v1008_v0  ;;  %v315_v3 = vmul.f32 0.5, %v314_v2  ;;  %vm395_vm2 = vcmask 64512   ;;  %s274_s21 = scalar_lea.vmem [#allocation7], %s1231_s12  ;;  %s694_s27 = sshll.u32 %s995_s18, 7 }
  0x7c   : > { %707 = vmatprep.subr.mxu1 %v1008_v0  ;;  %709 = vmatprep.mubr.msk.f32.mxu1 %vm1009_vm0, %v1008_v0  ;;  %v317_v7 = vld [vmem:[%s274_s21] sm:$0xff]  ;;  %s313_s5 = scalar_lea.vmem [#allocation9], %s1231_s12  ;;  %s1258_s13 = scalar_lea.hbm %s1344_s4, %s694_s27 }
  0x7d   : > { %703 = vmatpush3.xpose.msk.msra.mxu0 %vm318_vm1, %v316_v1  ;;  %708 = vmatpush3.msra.mxu1 %v317_v7  ;;  %s517_s29 = sshll.u32 %s313_s5, 4  ;;  %s489_s26 = scalar_lea.sflag [#allocation10], %s1228_s25  ;;  %s1260_s29 = int_to_ptr.vmem [resolvable:$true] %s517_s29 }
  0x7e   : > { %s885_s1 = scalar_lea.vmem %s1260_s29, 128  ;;  %p1371_p7 = scmp.ne.s32.totalorder %s1357_s28, 0 }
  0x7f   : > { %p886_p3 = scmp.ne.s32.totalorder %s1260_s29, %s885_s1  ;;  %s1010_s7 = smov [#allocation9]  }
  0x80   : > { %705 = vmatmul.mubr.msk.f32.vlgmr.msra.gmra.mrb[0].mxu0 %vm318_vm1, %v315_v3  ;;  %s889_s23 = sshll.u32 %s1010_s7, 4  ;;  %s890_s23 = int_to_ptr.vmem [resolvable:$false] %s889_s23 }
  0x81   : > { %p887_p0 = pnand %p886_p3, %p1371_p7  ;;  %s891_s6 = scalar_lea.vmem %s890_s23, 256 }
  0x82   : > { %p892_p8 = scmp.lt.s32.totalorder %s1260_s29, %s890_s23  ;;  %p893_p9 = scmp.lt.s32.totalorder %s891_s6, %s885_s1 }
  0x83   : > { %p888_p1 = pneg %p887_p0 }
  0x84   : > { %p894_p10 = por %p893_p9, %p892_p8 }
  0x86   : > { %p895_p12 = pnand %p894_p10, %p888_p1 }
 0x153   : > { %v391_v4 = vpop.f32.mrb[0].mxu0 }
 0x154   : > { %v706_v5 = vpop.f32.mrb[1].mxu0  ;;  %v396_v6 = vsel %vm395_vm2, %v391_v4, -inf }
 0x155   : > { %397 = vmax.xlane.f32.xlu0 %v396_v6 }
 0x1e2   : > { %v398_v8 = vpop.xlane.xlu0 %397 }
 0x1e3   : > { %v399_v9 = vsub.f32 %v391_v4, %v398_v8 }
 0x1e5   : > { %v400_v10 = vmul.f32 1.442695, %v399_v9 }
 0x1e7   : > { %791 = vpow2.f32 %v400_v10 }
 0x1f1   : > { %v792_v11 = vpop.eup %791 }
 0x1f2   : > { %710 = vmatmul.mubr.msk.f32.vlgmr.msra.gmra.mrb[0].mxu1 %vm395_vm2, %v792_v11  ;;  %v402_v12 = vsel %vm395_vm2, %v792_v11, 0.0 }
 0x1f3   : > { %403 = vadd.xlane.f32.xlu0 %v402_v12 }
 0x280   : > { %v404_v13 = vpop.xlane.xlu0 %403 }
 0x281   : > { %793 = vrcp.f32 %v404_v13 }
 0x28b   : > { %v794_v14 = vpop.eup %793 }
 0x28c   : > { %v480_v15 = vmul.f32 %v794_v14, %v792_v11 }
 0x28e   : > { %481 = vst.msk [vmem:[%s313_s5] sm:$0xff] %vm395_vm2, %v480_v15 }
 0x28f   : > { %898 = shalt.err (!%p895_p12)
}
 0x290   : > { %s899_s9 = scalar_lea.hbm %s1258_s13, 128  ;;  %s903_s19 = scalar_lea.hbm %s1344_s4, 1024 }
 0x291   : > { %p900_p11 = scmp.ne.s32.totalorder %s1258_s13, %s899_s9  ;;  %p904_p6 = scmp.lt.u32.totalorder %s1258_s13, %s1344_s4 }
 0x292   : > { %p905_p2 = scmp.lt.u32.totalorder %s903_s19, %s899_s9  ;;  %p907_p3 = scmp.lt.u32.totalorder %s899_s9, %s1258_s13 }
 0x293   : > { %p901_p5 = pnand %p900_p11, %p1371_p7 }
 0x294   : > { %p906_p13 = por %p905_p2, %p904_p6 }
 0x295   : > { %p902_p4 = pneg %p901_p5 }
 0x296   : > { %p908_p0 = por %p907_p3, %p906_p13 }
 0x298   : > { %p909_p1 = pnand %p908_p0, %p902_p4 }
 0x29a   : > { %912 = shalt.err (!%p909_p1)
}
 0x29b   : > { %719 = dma.vmem_to_hbm [thread:$0]  (%p1371_p7), %s1260_s29, 128, %s1258_s13, %s489_s26  }
 0x29c   : > { %s306_s24 = scalar_lea.vmem [#allocation8], %s1231_s12  ;;  %s1291_s11 = scalar_lea.hbm %s1343_s3, %s694_s27 }
 0x29d   : > { %s503_s21 = sshll.u32 %s306_s24, 4  ;;  %s484_s1 = scalar_lea.sflag [#allocation4], %s1228_s25  ;;  %s1293_s21 = int_to_ptr.vmem [resolvable:$true] %s503_s21 }
 0x29e   : > { %s913_s29 = scalar_lea.vmem %s1293_s21, 128  ;;  %s1011_s12 = smov [#allocation8]  }
 0x29f   : > { %p914_p8 = scmp.ne.s32.totalorder %s1293_s21, %s913_s29  ;;  %s917_s18 = sshll.u32 %s1011_s12, 4  ;;  %s918_s18 = int_to_ptr.vmem [resolvable:$false] %s917_s18 }
 0x2a0   : > { %s919_s13 = scalar_lea.vmem %s918_s18, 256  ;;  %p920_p12 = scmp.lt.s32.totalorder %s1293_s21, %s918_s18 }
 0x2a1   : > { %p915_p9 = pnand %p914_p8, %p1371_p7  ;;  %p921_p11 = scmp.lt.s32.totalorder %s919_s13, %s913_s29 }
 0x2a3   : > { %p916_p10 = pneg %p915_p9  ;;  %p922_p5 = por %p921_p11, %p920_p12 }
 0x2a5   : > { %p923_p4 = pnand %p922_p5, %p916_p10 }
 0x2c5   : > { %v475_v16 = vpop.f32.mrb[0].mxu1 }
 0x2c6   : > { %v479_v17 = vmul.f32 %v794_v14, %v475_v16  ;;  %v711_v18 = vpop.f32.mrb[1].mxu1 }
 0x2c8   : > { %482 = vst.msk [vmem:[%s306_s24] sm:$0xff] %vm318_vm1, %v479_v17 }
 0x2c9   : > { %926 = shalt.err (!%p923_p4)
}
 0x2ca   : > { %s927_s25 = scalar_lea.hbm %s1291_s11, 128  ;;  %s931_s7 = scalar_lea.hbm %s1343_s3, 1024 }
 0x2cb   : > { %p928_p6 = scmp.ne.s32.totalorder %s1291_s11, %s927_s25  ;;  %p932_p3 = scmp.lt.u32.totalorder %s1291_s11, %s1343_s3 }
 0x2cc   : > { %p933_p0 = scmp.lt.u32.totalorder %s931_s7, %s927_s25  ;;  %p935_p8 = scmp.lt.u32.totalorder %s927_s25, %s1291_s11 }
 0x2cd   : > { %p929_p2 = pnand %p928_p6, %p1371_p7 }
 0x2ce   : > { %p934_p1 = por %p933_p0, %p932_p3 }
 0x2cf   : > { %p930_p13 = pneg %p929_p2 }
 0x2d0   : > { %p936_p9 = por %p935_p8, %p934_p1 }
 0x2d2   : > { %p937_p10 = pnand %p936_p9, %p930_p13 }
 0x2d4   : > { %940 = shalt.err (!%p937_p10)
}
 0x2d5   : > { %718 = dma.vmem_to_hbm [thread:$0]  (%p1371_p7), %s1293_s21, 128, %s1291_s11, %s484_s1  }
 0x2d6 PF: > { %s1372_s9 = sld [smem:[#allocation18_spill]]  ;;  %p740_p12 = scmp.ge.s32.totalorder %s1003_s20, 2 }
 0x2d7   : > { %s529_s10 = sand.u32 1, %s983_s15  }
 0x2d8   : > { %s530_s30 = scalar_lea.sflag [#allocation4], %s529_s10 }
 0x2dc   : > { %p1373_p11 = scmp.ne.s32.totalorder %s1372_s9, 0 }
 0x2de   : > { %p733_p5 = pnand %p740_p12, %p1373_p11 }
 0x2e0   : > { %974 = dma.done.wait (!%p733_p5), %s530_s30, 128  }
 0x2e1   : > { %976 = vsyncadd (!%p733_p5), %s530_s30, 4294967168  ;;  %s539_s19 = scalar_lea.sflag [#allocation10], %s529_s10 }
 0x2e2   : > { %978 = dma.done.wait (!%p733_p5), %s539_s19, 128  }
 0x2e3   : > { %980 = vsyncadd (!%p733_p5), %s539_s19, 4294967168  ;;  %s27_s20 = sadd.s32 1, %s1003_s20   ;;  %s1374_s28 = sld [smem:[#allocation17_spill]] }
 0x2e4   : > { %p24_p4 = scmp.ge.s32.totalorder %s27_s20, 10   ;;  %s1375_s18 = sld [smem:[#allocation15_spill]] }
 0x2e5   : > { %s1376_s19 = sld [smem:[#allocation16_spill]]  ;;  %s1377_s15 = smov %s987_s16 }
 0x2e6   : > { %s1378_s16 = smov %s991_s17  ;;  %26 = sbr.rel (!%p24_p4) target bundleno = 12 (0xc), region = 118 }
 0x2e9   : > { %s1379_s17 = smov %s1374_s28 }
 0x2ed   :  { %544 = vsyncpa [#allocation3], 1 }
 0x2ee   :  { %546 = vsyncpa [#allocation3 + $0x1], 1 }
 0x2ef   :  { %547 = vsyncpa [#allocation6], 1 }
 0x2f0   :  { %549 = vsyncpa [#allocation6 + $0x1], 1 }
 0x2f1   :  { %550 = vsyncpa [#allocation4], 1 }
 0x2f2   :  { %552 = vsyncpa [#allocation4 + $0x1], 1 }
 0x2f3   :  { %553 = vsyncpa [#allocation10], 1 }
 0x2f4   :  { %555 = vsyncpa [#allocation10 + $0x1], 1 }

</bundles_post_ra>
